<compile_context>
chip_gen: v6e
topology: v6e:2x2x1
jax: 0.10.0
libtpu: 0.0.40
codegen_flags: <defaults>
</compile_context>

<pallas_src>
import functools

import numpy as np
import jax
import jax.numpy as jnp
from jax import lax
from jax.experimental import pallas as pl
from jax.experimental.pallas import tpu as pltpu


# --------------------------------------------------------------------------- #
# Kernel: one grid step == one "group" of S episodes packed along the lane axis
# --------------------------------------------------------------------------- #
def _metric_cf_kernel(targets_ref, feats_ref, former_ref, comb_ref, bias_ref,
                      ep_avg_ref, out_ref, proto_ref, *, mxu_dtype):
    feats = feats_ref[...]                                    # (Bg, D)
    feats_mx = feats.astype(mxu_dtype)                        # MXU input dtype
    former = former_ref[...].astype(jnp.float32)              # (Pf, D)

    pf = former.shape[0]
    nmax = comb_ref.shape[0]                                  # novel slots / group
    p_all = pf + nmax
    bg = feats.shape[0]

    # ---- fused prototype bank: former rows + novel shot-means in one scratch
    novel = jnp.dot(comb_ref[...].astype(mxu_dtype), feats_mx,
                    preferred_element_type=jnp.float32)       # (Nmax, D) f32 acc
    proto_ref[pl.ds(0, pf), :] = former
    proto_ref[pl.ds(pf, nmax), :] = novel
    protos = proto_ref[...]                                   # (P_all, D) f32

    # ---- single cross matmul + single ||p||^2 (VPU mul + lane reduce)
    nt = (((1,), (1,)), ((), ()))                             # contract over D
    cross = lax.dot_general(protos.astype(mxu_dtype), feats_mx, nt,
                            preferred_element_type=jnp.float32)   # (P_all, Bg)
    p2 = jnp.sum(protos * protos, axis=1, keepdims=True)      # (P_all, 1)

    # logits up to the per-sample +||f||^2 constant (cancels in CE / argmax);
    # bias = 0 for former rows and own-episode valid novel rows, -1e30 for
    # padded novel slots and other episodes' novel rows.
    logits = 2.0 * cross - p2 + bias_ref[...]                 # (P_all, Bg) f32

    tgt = targets_ref[...]                                    # (1, Bg) int32
    row = lax.broadcasted_iota(jnp.int32, (p_all, bg), 0)     # single iota

    # joint softmax cross-entropy, per sample
    m = jnp.max(logits, axis=0, keepdims=True)                # (1, Bg)
    lse = m + jnp.log(jnp.sum(jnp.exp(logits - m), axis=0, keepdims=True))
    tgt_logit = jnp.sum(jnp.where(row == tgt, logits, 0.0), axis=0, keepdims=True)
    loss_vec = lse - tgt_logit                                # (1, Bg)

    # first-hit argmax accuracy (same tie-break as torch.argmax); the SAME
    # logits tensor feeds CE and argmax, so matmul-precision changes cannot
    # de-synchronize them.
    first_max = jnp.min(jnp.where(logits == m, row, p_all), axis=0, keepdims=True)
    corr_vec = (first_max == tgt).astype(jnp.float32)         # (1, Bg)

    # per-episode means (weights 1/B on each episode's own columns)
    ep_avg = ep_avg_ref[...]                                  # (S, Bg)
    out_ref[:, 0:1] = jnp.sum(ep_avg * loss_vec, axis=1, keepdims=True)  # (S,1)
    out_ref[:, 1:2] = jnp.sum(ep_avg * corr_vec, axis=1, keepdims=True)  # (S,1)


# --------------------------------------------------------------------------- #
# Cached pallas_call + jit wrapper, one compile per static configuration
# --------------------------------------------------------------------------- #
@functools.lru_cache(maxsize=None)
def _build_runner(n_groups, eps_per_group, batch_g, embed_dim, n_former,
                  n_slots_g, use_bf16):
    p_all = n_former + n_slots_g
    kernel = functools.partial(
        _metric_cf_kernel,
        mxu_dtype=jnp.bfloat16 if use_bf16 else jnp.float32)

    call = pl.pallas_call(
        kernel,
        out_shape=jax.ShapeDtypeStruct((n_groups, eps_per_group, 2), jnp.float32),
        grid=(n_groups,),
        in_specs=[
            pl.BlockSpec((pl.Squeezed(), 1, batch_g), lambda g: (g, 0, 0)),         # targets
            pl.BlockSpec((pl.Squeezed(), batch_g, embed_dim), lambda g: (g, 0, 0)), # feats
            # former protos are shared across all groups (single whole-array
            # block; tile over Pf only if this ever grows to tens of MB).
            pl.BlockSpec((n_former, embed_dim), lambda g: (0, 0)),                  # former
            pl.BlockSpec((pl.Squeezed(), n_slots_g, batch_g), lambda g: (g, 0, 0)), # comb
            pl.BlockSpec((pl.Squeezed(), p_all, batch_g), lambda g: (g, 0, 0)),     # bias
            pl.BlockSpec((eps_per_group, batch_g), lambda g: (0, 0)),               # ep_avg
        ],
        out_specs=pl.BlockSpec((pl.Squeezed(), eps_per_group, 2),
                               lambda g: (g, 0, 0)),
        scratch_shapes=[pltpu.VMEM((p_all, embed_dim), jnp.float32)],
        compiler_params=pltpu.CompilerParams(
            dimension_semantics=("parallel",)),   # v7x: 2 TCs split the groups
    )

    @jax.jit
    def run(targets, feats, former, comb, bias, ep_avg, w):
        out = call(targets, feats, former, comb, bias, ep_avg)   # (G, S, 2)
        loss = out[..., 0].reshape(-1) * jnp.asarray(w, jnp.float32)
        acc = out[..., 1].reshape(-1)
        return loss, acc

    return run


# --------------------------------------------------------------------------- #
# Host-side episode bookkeeping (memoized; no per-call host work / transfers)
# --------------------------------------------------------------------------- #
@functools.lru_cache(maxsize=None)
def _episode_plan(way_keys, former_key, n_shots, eps_per_group):
    # TODO(synk): the data-dependent class-label -> prototype-index loop has no
    # Pallas equivalent (torch does it on CPU via .item()/.index() too); it
    # stays on host, memoized per label mix, results kept resident on device.
    n_eps = len(way_keys)
    assert n_eps % eps_per_group == 0
    n_groups = n_eps // eps_per_group
    n_ways = len(way_keys[0])
    n_former = len(former_key)
    former_list = list(former_key)
    batch = n_ways * n_shots
    batch_g = eps_per_group * batch
    n_slots_g = eps_per_group * n_ways           # static novel-slot budget / group
    p_all = n_former + n_slots_g

    targets = np.zeros((n_groups, 1, batch_g), np.int32)
    comb = np.zeros((n_groups, n_slots_g, batch_g), np.float32)
    bias = np.full((n_groups, p_all, batch_g), -1e30, np.float32)
    bias[:, :n_former, :] = 0.0                  # former protos valid everywhere

    for e, ways in enumerate(way_keys):
        g, s = divmod(e, eps_per_group)
        col0 = s * batch
        novel_count = 0
        for i, cl in enumerate(ways):
            c_lo, c_hi = col0 + i * n_shots, col0 + (i + 1) * n_shots
            if cl in former_list:
                targets[g, 0, c_lo:c_hi] = former_list.index(cl)
            else:
                slot = s * n_ways + novel_count
                novel_count += 1
                targets[g, 0, c_lo:c_hi] = n_former + slot
                comb[g, slot, c_lo:c_hi] = 1.0 / n_shots
        # this episode's valid novel slots only join its own columns' softmax
        bias[g, n_former + s * n_ways: n_former + s * n_ways + novel_count,
             col0:col0 + batch] = 0.0

    ep_avg = np.zeros((eps_per_group, batch_g), np.float32)
    for s in range(eps_per_group):
        ep_avg[s, s * batch:(s + 1) * batch] = 1.0 / batch

    return (jnp.asarray(targets), jnp.asarray(comb), jnp.asarray(bias),
            jnp.asarray(ep_avg))


# --------------------------------------------------------------------------- #
# Public wrappers
# --------------------------------------------------------------------------- #
def incremental_metric_cf_loss_batched(former_proto, former_pt_labels, feats,
                                       labels, w=1.0, num_instances=5,
                                       episodes_per_group=None, use_bf16=True):
    """Batched IncrementalMetricCFLoss over E independent episodes.

    feats : (E, B, D) device array (episodes stacked).
    labels: (E, B) HOST ints (numpy / lists).  Pass host labels - passing a
            device array forces a blocking device->host copy (the torch module
            does the same via .item(), but it dominates wall clock here).
    Returns (loss (E,), acc (E,)) device arrays, loss already scaled by w.
    """
    feats = jnp.asarray(feats)
    n_eps, batch, embed_dim = feats.shape
    n_shots = int(num_instances)
    n_ways = batch // n_shots

    labels_np = np.asarray(labels).reshape(n_eps, n_ways, n_shots)   # host only
    way_keys = tuple(tuple(int(c) for c in labels_np[e, :, 0]) for e in range(n_eps))
    former_key = tuple(int(x) for x in np.asarray(former_pt_labels).reshape(-1))
    assert former_key, "empty former_proto not supported"  # TODO(synk): n_former==0 edge case

    if episodes_per_group is None:
        episodes_per_group = n_eps            # fill lanes within a single grid step
    assert n_eps % episodes_per_group == 0
    n_groups = n_eps // episodes_per_group
    batch_g = episodes_per_group * batch
    n_slots_g = episodes_per_group * n_ways
    n_former = len(former_key)

    targets, comb, bias, ep_avg = _episode_plan(way_keys, former_key, n_shots,
                                                episodes_per_group)
    run = _build_runner(n_groups, episodes_per_group, batch_g, embed_dim,
                        n_former, n_slots_g, bool(use_bf16))

    feats_g = feats.reshape(n_groups, batch_g, embed_dim)
    former_proto = jnp.asarray(former_proto)
    # w is a traced argument of the cached jit -> changing it never recompiles.
    return run(targets, feats_g, former_proto, comb, bias, ep_avg,
               jnp.asarray(w, jnp.float32))


def incremental_metric_cf_loss(former_proto, former_pt_labels, feats, labels,
                               w=1.0, num_instances=5, use_bf16=True):
    """JAX/Pallas equivalent of IncrementalMetricCFLoss.forward (one episode)."""
    feats = jnp.asarray(feats)
    loss, acc = incremental_metric_cf_loss_batched(
        former_proto, former_pt_labels, feats[None], np.asarray(labels)[None],
        w=w, num_instances=num_instances, episodes_per_group=1,
        use_bf16=use_bf16)
    return loss[0], acc[0]


# --------------------------------------------------------------------------- #
# Pure numpy reference mirroring the PyTorch module (squared Euclidean)
# --------------------------------------------------------------------------- #
def _reference(former_proto, former_pt_labels, feats, labels, w, num_instances):
    former_proto = np.asarray(former_proto, np.float64)
    feats = np.asarray(feats, np.float64)
    batch, _ = feats.shape
    n_shots = int(num_instances)
    n_ways = batch // n_shots
    former_pt_labels = [int(x) for x in np.asarray(former_pt_labels).tolist()]
    class_labels = np.asarray(labels).reshape(n_ways, n_shots)[:, 0]
    feats3 = feats.reshape(n_ways, n_shots, -1)

    tgt, novel = [], []
    for i in range(n_ways):
        cl = int(class_labels[i])
        if cl in former_pt_labels:
            tgt.append(former_pt_labels.index(cl))
        else:
            tgt.append(len(former_pt_labels) + len(novel))
            novel.append(feats3[i].mean(axis=0))
    all_proto = np.concatenate([former_proto, np.stack(novel)], axis=0)
    tgt = np.repeat(np.asarray(tgt), n_shots)

    diff = feats[:, None, :] - all_proto[None, :, :]
    logits = -(diff ** 2).sum(-1)
    est = logits.argmax(axis=1)
    acc = (est == tgt).mean()
    m = logits.max(axis=1, keepdims=True)
    lse = m[:, 0] + np.log(np.exp(logits - m).sum(axis=1))
    loss = (lse - logits[np.arange(batch), tgt]).mean()
    return loss * w, acc


if __name__ == "__main__":
    key = jax.random.PRNGKey(0)
    k_proto, k_feats = jax.random.split(key)

    num_instances = 5                        # n_shots
    n_ways = 4
    batch = n_ways * num_instances           # 20
    embed_dim = 128
    n_former = 6
    n_episodes = 4

    # host-side label metadata (no device->host sync in the hot path)
    former_pt_labels = np.arange(n_former, dtype=np.int32)        # classes 0..5
    way_classes = np.array([[2, 7, 5, 9],                         # 2 former, 2 novel
                            [11, 0, 13, 3],                       # 2 former, 2 novel
                            [6, 8, 10, 12],                       # all novel
                            [1, 4, 14, 15]], np.int32)            # 2 former, 2 novel
    labels = np.repeat(way_classes, num_instances, axis=1)        # (4, 20) host

    former_proto = jax.random.normal(k_proto, (n_former, embed_dim), jnp.float32)
    feats_all = jax.random.normal(k_feats, (n_episodes, batch, embed_dim),
                                  jnp.float32)

    former_np = np.asarray(former_proto)
    feats_np = np.asarray(feats_all)
    refs = [_reference(former_np, former_pt_labels, feats_np[e], labels[e],
                       1.0, num_instances) for e in range(n_episodes)]
    ref_loss = np.array([r[0] for r in refs])
    ref_acc = np.array([r[1] for r in refs])

    # 1) single episode, f32 MXU path: tight check of the fused kernel
    loss32, acc32 = incremental_metric_cf_loss(
        former_proto, former_pt_labels, feats_all[0], labels[0],
        w=1.0, num_instances=num_instances, use_bf16=False)
    jax.block_until_ready((loss32, acc32))
    np.testing.assert_allclose(float(loss32), ref_loss[0], rtol=1e-3, atol=1e-3)
    np.testing.assert_allclose(float(acc32), ref_acc[0], rtol=1e-6, atol=1e-6)

    # 2) single episode, default bf16 MXU path (f32 accumulation / VPU math)
    loss_bf, acc_bf = incremental_metric_cf_loss(
        former_proto, former_pt_labels, feats_all[0], labels[0],
        w=1.0, num_instances=num_instances)
    jax.block_until_ready((loss_bf, acc_bf))
    np.testing.assert_allclose(float(loss_bf), ref_loss[0], rtol=2e-2, atol=2e-2)
    np.testing.assert_allclose(float(acc_bf), ref_acc[0], rtol=1e-6, atol=1e-6)

    # 3) new w reuses the cached compilation (w applied outside the kernel)
    loss_w, _ = incremental_metric_cf_loss(
        former_proto, former_pt_labels, feats_all[0], labels[0],
        w=0.5, num_instances=num_instances)
    jax.block_until_ready(loss_w)
    np.testing.assert_allclose(float(loss_w), 0.5 * ref_loss[0],
                               rtol=2e-2, atol=2e-2)

    # 4) lane-packed episodes, 2 per grid step -> grid=(2,) "parallel"
    #    (f32 path for a tight check of the grouping / masking logic)
    loss_g, acc_g = incremental_metric_cf_loss_batched(
        former_proto, former_pt_labels, feats_all, labels,
        w=1.0, num_instances=num_instances, episodes_per_group=2,
        use_bf16=False)
    jax.block_until_ready((loss_g, acc_g))
    np.testing.assert_allclose(np.asarray(loss_g), ref_loss, rtol=1e-3, atol=1e-3)
    np.testing.assert_allclose(np.asarray(acc_g), ref_acc, rtol=1e-6, atol=1e-6)

    # 5) all 4 episodes in one grid step (80 live lanes), default bf16 path
    loss_b, acc_b = incremental_metric_cf_loss_batched(
        former_proto, former_pt_labels, feats_all, labels,
        w=1.0, num_instances=num_instances)
    jax.block_until_ready((loss_b, acc_b))
    np.testing.assert_allclose(np.asarray(loss_b), ref_loss, rtol=2e-2, atol=2e-2)
    np.testing.assert_allclose(np.asarray(acc_b), ref_acc, rtol=1e-6, atol=1e-6)

    print("KERNEL_OK")
</pallas_src>

<mosaic_0001>
module attributes {stable_mosaic.version = 11 : i64} {
  func.func @_metric_cf_kernel(%arg0: i32, %arg1: memref<1x1x20xi32, #tpu.memory_space<vmem>>, %arg2: memref<1x20x128xf32, #tpu.memory_space<vmem>>, %arg3: memref<6x128xf32, #tpu.memory_space<vmem>>, %arg4: memref<1x4x20xf32, #tpu.memory_space<vmem>>, %arg5: memref<1x10x20xf32, #tpu.memory_space<vmem>>, %arg6: memref<1x20xf32, #tpu.memory_space<vmem>>, %arg7: memref<1x1x2xf32, #tpu.memory_space<vmem>>, %arg8: memref<10x128xf32, #tpu.memory_space<vmem>>) attributes {dimension_semantics = [#tpu.dimension_semantics<parallel>], iteration_bounds = array<i64: 1>, scalar_prefetch = 0 : i64, scratch_operands = 1 : i64, tpu.core_type = #tpu.core_type<tc>, window_params = [{transform_indices = @transform_0, window_bounds = array<i64: 1, 1, 20>}, {transform_indices = @transform_1, window_bounds = array<i64: 1, 20, 128>}, {pipeline_mode = #tpu.pipeline_mode<synchronous>, transform_indices = @transform_2, window_bounds = array<i64: 6, 128>}, {transform_indices = @transform_3, window_bounds = array<i64: 1, 4, 20>}, {transform_indices = @transform_4, window_bounds = array<i64: 1, 10, 20>}, {pipeline_mode = #tpu.pipeline_mode<synchronous>, transform_indices = @transform_5, window_bounds = array<i64: 1, 20>}, {transform_indices = @transform_6, window_bounds = array<i64: 1, 1, 2>}]} {
    %c0 = arith.constant 0 : index
    %c0_0 = arith.constant 0 : index
    %c0_1 = arith.constant 0 : index
    %0 = vector.load %arg2[%c0, %c0_0, %c0_1] : memref<1x20x128xf32, #tpu.memory_space<vmem>>, vector<1x20x128xf32>
    %1 = vector.shape_cast %0 : vector<1x20x128xf32> to vector<20x128xf32>
    %c0_2 = arith.constant 0 : index
    %c0_3 = arith.constant 0 : index
    %2 = vector.load %arg3[%c0_2, %c0_3] : memref<6x128xf32, #tpu.memory_space<vmem>>, vector<6x128xf32>
    %c0_4 = arith.constant 0 : index
    %c0_5 = arith.constant 0 : index
    %c0_6 = arith.constant 0 : index
    %3 = vector.load %arg4[%c0_4, %c0_5, %c0_6] : memref<1x4x20xf32, #tpu.memory_space<vmem>>, vector<1x4x20xf32>
    %4 = vector.shape_cast %3 : vector<1x4x20xf32> to vector<4x20xf32>
    %cst = arith.constant dense<0.000000e+00> : vector<4x128xf32>
    %5 = tpu.matmul %4, %1, %cst {dimension_numbers = #tpu.dot_dimension_numbers<[1], [0], [0], [1], [0, 0, 1, 1], [], []>} : vector<4x20xf32>, vector<20x128xf32>, vector<4x128xf32> -> vector<4x128xf32>
    %c0_7 = arith.constant 0 : index
    %c0_8 = arith.constant 0 : index
    %6 = vector.load %arg8[%c0_7, %c0_8] : memref<10x128xf32, #tpu.memory_space<vmem>>, vector<6x128xf32>
    tpu.vector_store %arg8[%c0_7, %c0_8], %2 {strides = array<i32>} : memref<10x128xf32, #tpu.memory_space<vmem>>, vector<6x128xf32>,
    %c6 = arith.constant 6 : index
    %c0_9 = arith.constant 0 : index
    %7 = vector.load %arg8[%c6, %c0_9] : memref<10x128xf32, #tpu.memory_space<vmem>>, vector<4x128xf32>
    tpu.vector_store %arg8[%c6, %c0_9], %5 {strides = array<i32>} : memref<10x128xf32, #tpu.memory_space<vmem>>, vector<4x128xf32>,
    %c0_10 = arith.constant 0 : index
    %c0_11 = arith.constant 0 : index
    %8 = vector.load %arg8[%c0_10, %c0_11] : memref<10x128xf32, #tpu.memory_space<vmem>>, vector<10x128xf32>
    %cst_12 = arith.constant dense<0.000000e+00> : vector<10x20xf32>
    %9 = tpu.matmul %8, %1, %cst_12 {dimension_numbers = #tpu.dot_dimension_numbers<[1], [1], [0], [0], [0, 0, 1, 0], [], []>} : vector<10x128xf32>, vector<20x128xf32>, vector<10x20xf32> -> vector<10x20xf32>
    %10 = arith.mulf %8, %8 : vector<10x128xf32>
    %cst_13 = arith.constant dense<0.000000e+00> : vector<10xf32>
    %11 = vector.multi_reduction <add>, %10, %cst_13 [1] : vector<10x128xf32> to vector<10xf32>
    %12 = vector.shape_cast %11 : vector<10xf32> to vector<10x1xf32>
    %cst_14 = arith.constant 2.000000e+00 : f32
    %13 = vector.broadcast %cst_14 : f32 to vector<10x20xf32>
    %14 = arith.mulf %13, %9 : vector<10x20xf32>
    %15 = vector.broadcast %12 : vector<10x1xf32> to vector<10x20xf32>
    %16 = arith.subf %14, %15 : vector<10x20xf32>
    %c0_15 = arith.constant 0 : index
    %c0_16 = arith.constant 0 : index
    %c0_17 = arith.constant 0 : index
    %17 = vector.load %arg5[%c0_15, %c0_16, %c0_17] : memref<1x10x20xf32, #tpu.memory_space<vmem>>, vector<1x10x20xf32>
    %18 = vector.shape_cast %17 : vector<1x10x20xf32> to vector<10x20xf32>
    %19 = arith.addf %16, %18 : vector<10x20xf32>
    %c0_18 = arith.constant 0 : index
    %c0_19 = arith.constant 0 : index
    %c0_20 = arith.constant 0 : index
    %20 = vector.load %arg1[%c0_18, %c0_19, %c0_20] : memref<1x1x20xi32, #tpu.memory_space<vmem>>, vector<1x1x20xi32>
    %21 = vector.shape_cast %20 : vector<1x1x20xi32> to vector<1x20xi32>
    %22 = tpu.iota {dimensions = array<i32: 0>} : vector<10x20xi32>
    %cst_21 = arith.constant dense<0xFF800000> : vector<20xf32>
    %23 = vector.multi_reduction <maximumf>, %19, %cst_21 [0] : vector<10x20xf32> to vector<20xf32>
    %24 = vector.shape_cast %23 : vector<20xf32> to vector<1x20xf32>
    %25 = vector.broadcast %24 : vector<1x20xf32> to vector<10x20xf32>
    %26 = arith.subf %19, %25 : vector<10x20xf32>
    %27 = math.exp %26 : vector<10x20xf32>
    %cst_22 = arith.constant dense<0.000000e+00> : vector<20xf32>
    %28 = vector.multi_reduction <add>, %27, %cst_22 [0] : vector<10x20xf32> to vector<20xf32>
    %29 = vector.shape_cast %28 : vector<20xf32> to vector<1x20xf32>
    %30 = math.log %29 : vector<1x20xf32>
    %31 = arith.addf %24, %30 : vector<1x20xf32>
    %32 = vector.broadcast %21 : vector<1x20xi32> to vector<10x20xi32>
    %33 = arith.cmpi eq, %22, %32 : vector<10x20xi32>
    %cst_23 = arith.constant 0.000000e+00 : f32
    %34 = vector.broadcast %cst_23 : f32 to vector<10x20xf32>
    %35 = arith.select %33, %19, %34 : vector<10x20xi1>, vector<10x20xf32>
    %cst_24 = arith.constant dense<0.000000e+00> : vector<20xf32>
    %36 = vector.multi_reduction <add>, %35, %cst_24 [0] : vector<10x20xf32> to vector<20xf32>
    %37 = vector.shape_cast %36 : vector<20xf32> to vector<1x20xf32>
    %38 = arith.subf %31, %37 : vector<1x20xf32>
    %39 = vector.broadcast %24 : vector<1x20xf32> to vector<10x20xf32>
    %40 = arith.cmpf oeq, %19, %39 : vector<10x20xf32>
    %c10_i32 = arith.constant 10 : i32
    %41 = vector.broadcast %c10_i32 : i32 to vector<10x20xi32>
    %42 = arith.select %40, %22, %41 : vector<10x20xi1>, vector<10x20xi32>
    %cst_25 = arith.constant dense<2147483647> : vector<20xi32>
    %43 = vector.multi_reduction <minsi>, %42, %cst_25 [0] : vector<10x20xi32> to vector<20xi32>
    %44 = vector.shape_cast %43 : vector<20xi32> to vector<1x20xi32>
    %45 = arith.cmpi eq, %44, %21 : vector<1x20xi32>
    %46 = arith.extui %45 : vector<1x20xi1> to vector<1x20xi32>
    %47 = arith.sitofp %46 : vector<1x20xi32> to vector<1x20xf32>
    %c0_26 = arith.constant 0 : index
    %c0_27 = arith.constant 0 : index
    %48 = vector.load %arg6[%c0_26, %c0_27] : memref<1x20xf32, #tpu.memory_space<vmem>>, vector<1x20xf32>
    %49 = arith.mulf %48, %38 : vector<1x20xf32>
    %cst_28 = arith.constant dense<0.000000e+00> : vector<1xf32>
    %50 = vector.multi_reduction <add>, %49, %cst_28 [1] : vector<1x20xf32> to vector<1xf32>
    %51 = vector.shape_cast %50 : vector<1xf32> to vector<1x1xf32>
    %c0_29 = arith.constant 0 : index
    %c0_30 = arith.constant 0 : index
    %c0_31 = arith.constant 0 : index
    %52 = vector.load %arg7[%c0_29, %c0_30, %c0_31] : memref<1x1x2xf32, #tpu.memory_space<vmem>>, vector<1x1x1xf32>
    %53 = vector.shape_cast %52 : vector<1x1x1xf32> to vector<1x1xf32>
    %54 = vector.shape_cast %51 : vector<1x1xf32> to vector<1x1x1xf32>
    tpu.vector_store %arg7[%c0_29, %c0_30, %c0_31], %54 {strides = array<i32>} : memref<1x1x2xf32, #tpu.memory_space<vmem>>, vector<1x1x1xf32>,
    %55 = arith.mulf %48, %47 : vector<1x20xf32>
    %cst_32 = arith.constant dense<0.000000e+00> : vector<1xf32>
    %56 = vector.multi_reduction <add>, %55, %cst_32 [1] : vector<1x20xf32> to vector<1xf32>
    %57 = vector.shape_cast %56 : vector<1xf32> to vector<1x1xf32>
    %c0_33 = arith.constant 0 : index
    %c0_34 = arith.constant 0 : index
    %c1 = arith.constant 1 : index
    %58 = vector.load %arg7[%c0_33, %c0_34, %c1] : memref<1x1x2xf32, #tpu.memory_space<vmem>>, vector<1x1x1xf32>
    %59 = vector.shape_cast %58 : vector<1x1x1xf32> to vector<1x1xf32>
    %60 = vector.shape_cast %57 : vector<1x1xf32> to vector<1x1x1xf32>
    tpu.vector_store %arg7[%c0_33, %c0_34, %c1], %60 {strides = array<i32>} : memref<1x1x2xf32, #tpu.memory_space<vmem>>, vector<1x1x1xf32>,
    return
  }
  func.func @transform_0(%arg0: i32) -> (i32, i32, i32) {
    %c0_i32 = arith.constant 0 : i32
    %c0_i32_0 = arith.constant 0 : i32
    %c0_i32_1 = arith.constant 0 : i32
    return %arg0, %c0_i32, %c0_i32_0 : i32, i32, i32
  }
  func.func @transform_1(%arg0: i32) -> (i32, i32, i32) {
    %c0_i32 = arith.constant 0 : i32
    %c0_i32_0 = arith.constant 0 : i32
    %c0_i32_1 = arith.constant 0 : i32
    return %arg0, %c0_i32, %c0_i32_0 : i32, i32, i32
  }
  func.func @transform_2(%arg0: i32) -> (i32, i32) {
    %c0_i32 = arith.constant 0 : i32
    %c0_i32_0 = arith.constant 0 : i32
    %c0_i32_1 = arith.constant 0 : i32
    return %c0_i32, %c0_i32_0 : i32, i32
  }
  func.func @transform_3(%arg0: i32) -> (i32, i32, i32) {
    %c0_i32 = arith.constant 0 : i32
    %c0_i32_0 = arith.constant 0 : i32
    %c0_i32_1 = arith.constant 0 : i32
    return %arg0, %c0_i32, %c0_i32_0 : i32, i32, i32
  }
  func.func @transform_4(%arg0: i32) -> (i32, i32, i32) {
    %c0_i32 = arith.constant 0 : i32
    %c0_i32_0 = arith.constant 0 : i32
    %c0_i32_1 = arith.constant 0 : i32
    return %arg0, %c0_i32, %c0_i32_0 : i32, i32, i32
  }
  func.func @transform_5(%arg0: i32) -> (i32, i32) {
    %c0_i32 = arith.constant 0 : i32
    %c0_i32_0 = arith.constant 0 : i32
    %c0_i32_1 = arith.constant 0 : i32
    return %c0_i32, %c0_i32_0 : i32, i32
  }
  func.func @transform_6(%arg0: i32) -> (i32, i32, i32) {
    %c0_i32 = arith.constant 0 : i32
    %c0_i32_0 = arith.constant 0 : i32
    %c0_i32_1 = arith.constant 0 : i32
    return %arg0, %c0_i32, %c0_i32_0 : i32, i32, i32
  }
}

</mosaic_0001>

<bundles_post_ra>
// kernel: run.1
= control target key start
LH: loop header
LB: loop body
LE: loop exit
PB: predicated region body
PF: predicated region fallthrough
CT: control target
= control target key end

     0   :  { %vm32_vm0 = vcmask 1043456   ;;  %v327_v0 = vmov 0.0   ;;  %vm328_vm1 = vmmov 0   ;;  %vm28_vm2 = vcmask 162816   ;;  %s411_s1 = inlined_call_operand.vmem [shape: f32[1,20,128], index: 1, kind: input, shape index: {}]   ;;  %s412_s3 = inlined_call_operand.vmem [shape: f32[1,4,20], index: 3, kind: input, shape index: {}]   ;;  %s413_s2 = inlined_call_operand.vmem [shape: f32[6,128], index: 2, kind: input, shape index: {}]   ;;  %s414_s4 = inlined_call_operand.vmem [shape: f32[1,10,20], index: 4, kind: input, shape index: {}]   ;;  %s415_s0 = inlined_call_operand.vmem [shape: s32[1,1,20], index: 0, kind: input, shape index: {}]   ;;  %s416_s5 = inlined_call_operand.vmem [shape: f32[1,20], index: 5, kind: input, shape index: {}]   ;;  %s417_s6 = inlined_call_operand.vmem [shape: f32[1,1,2], index: 6, kind: output, shape index: {}]  }
   0x1   :  { %301 = vmatprep.subr.mxu0 %v327_v0  ;;  %v25_v1 = vld [vmem:[%s411_s1 + $0x10] sm:$0xf]  ;;  %v24_v2 = vld [vmem:[%s411_s1 + $0x8] sm:$0xff]  ;;  %307 = vmatprep.mubr.msk.f32.mxu0 %vm328_vm1, %v327_v0  ;;  %v23_v3 = vld [vmem:[%s411_s1] sm:$0xff]  ;;  %vm189_vm3 = vcmask 1041408   ;;  %vm206_vm4 = vcmask 156672   ;;  %v202_v34 = vlaneseq }
   0x2   :  { %302 = vmatpush3.msk.msra.mxu0 %vm32_vm0, %v25_v1  ;;  %310 = vmatprep.subr.mxu1 %v25_v1  ;;  %v27_v4 = vld [vmem:[%s412_s3] sm:$0xf]  ;;  %v198_v17 = vld [vmem:[%s414_s4 + $0x8] sm:$0x3]  ;;  %vm273_vm14 = vcmask 155648   ;;  %vm277_vm15 = vcmask 0  }
   0x3   :  { %303 = vmatprep.subr.mxu0 %v327_v0  ;;  %311 = vmatpush3.xpose.msra.mxu1 %v25_v1  ;;  %v26_v5 = vld [vmem:[%s413_s2] sm:$0x3f]  ;;  %v203_v39 = vshrl.u32 %v202_v34, 7  ;;  %vm283_vm0 = vcmask 8200  }
   0x4   :  { %304 = vmatpush3.msra.mxu0 %v24_v2  ;;  %312 = vmatprep.subr.mxu1 %v24_v2  ;;  %106 = vst [vmem:[#allocation2] sm:$0x3f] %v26_v5  ;;  %v197_v21 = vld [vmem:[%s414_s4] sm:$0xff] }
   0x5   :  { %305 = vmatprep.subr.mxu0 %v327_v0  ;;  %v204_v40 = vadd.s32 8, %v203_v39  ;;  %v235_v43 = vsub.s32 0, %v203_v39  ;;  %v201_v46 = vld [vmem:[%s415_s0] sm:$0x1] }
   0x6   :  { %306 = vmatpush3.msra.mxu0 %v23_v3 }
   0x7   :  { %308 = vmatmul.mubr.msk.f32.vlgmr.msra.gmra.mxu0 %vm28_vm2, %v27_v4  ;;  %313 = vmatpush3.xpose.msra.mxu1 %v24_v2  ;;  %v236_v47 = vrot.slane %v201_v46, %v235_v43 }
   0x8   :  { %314 = vmatprep.subr.mxu1 %v23_v3 }
   0x9   :  { %vm237_vm8 = vcmp.eq.s32.totalorder %v203_v39, %v236_v47  ;;  %vm238_vm9 = vcmp.eq.s32.totalorder %v204_v40, %v236_v47 }
   0xb   :  { %315 = vmatpush3.xpose.msra.mxu1 %v23_v3 }
  0xc7   :  { %v102_v6 = vpop.f32.mrf.mxu0 }
  0xc8   :  { %107 = vst [vmem:[#allocation2 + $0x6] sm:$0xf] %v102_v6 }
  0xc9   :  { %v309_v7 = vpop.f32.mrf.mxu0 }
  0xcf   :  { %v108_v8 = vld [vmem:[#allocation2] sm:$0xff]  ;;  %v109_v9 = vld [vmem:[#allocation2 + $0x8] sm:$0x3] }
  0xd0   :  { %316 = vmatprep.mubr.f32.mxu1 %v108_v8  ;;  %v185_v10 = vmul.f32 %v108_v8, %v108_v8  ;;  %v186_v11 = vmul.f32 %v109_v9, %v109_v9 }
  0xd1   :  { %317 = vmatmul.mubr.f32.vlgmr.msra.gmra.mxu1 %v109_v9 }
  0xd2   :  { %187 = vadd.xlane.f32.xlu0 %v185_v10  ;;  %v190_v12 = vsel %vm189_vm3, %v186_v11, 0.0 }
  0xd6   :  { %191 = vadd.xlane.f32.xlu0 %v190_v12 }
 0x15b   :  { %v188_v13 = vpop.xlane.xlu0 %187 }
 0x15f   :  { %v192_v16 = vpop.xlane.xlu0 %191 }
 0x191   :  { %v318_v14 = vpop.f32.mrf.mxu1 }
 0x192   :  { %v194_v15 = vmul.f32 2.0, %v318_v14 }
 0x193   :  { %v176_v18 = vpop.f32.mrf.mxu1 }
 0x194   :  { %v196_v19 = vsub.f32 %v194_v15, %v192_v16  ;;  %v193_v20 = vmul.f32 2.0, %v176_v18  ;;  %v271_v18 = vld [vmem:[%s416_s5] sm:$0x1] }
 0x196   :  { %v200_v22 = vadd.f32 %v198_v17, %v196_v19  ;;  %v195_v23 = vsub.f32 %v193_v20, %v188_v13 }
 0x198   :  { %v199_v24 = vadd.f32 %v197_v21, %v195_v23  ;;  %v207_v25 = vsel %vm206_vm4, %v200_v22, -inf  ;;  %v240_v56 = vsel %vm238_vm9, %v200_v22, 0.0 }
 0x199   :  { %v242_v60 = vsel %vm206_vm4, %v240_v56, 0.0 }
 0x19a   :  { %v205_v26 = vsel %vm28_vm2, %v199_v24, -inf  ;;  %v239_v53 = vsel %vm237_vm8, %v199_v24, 0.0 }
 0x19b   :  { %v208_v27 = vmax.f32 %v205_v26, %v207_v25  ;;  %v241_v58 = vsel %vm28_vm2, %v239_v53, 0.0 }
 0x19c   :  { %v243_v62 = vadd.f32 %v242_v60, %v241_v58 }
 0x19d   :  { %v209_v28 = vrot.slane %v208_v27, 4 }
 0x19e   :  { %v244_v3 = vrot.slane %v243_v62, 4 }
 0x19f   :  { %v210_v29 = vmax.f32 %v208_v27, %v209_v28 }
 0x1a0   :  { %v245_v6 = vadd.f32 %v244_v3, %v243_v62 }
 0x1a1   :  { %v211_v30 = vrot.slane %v210_v29, 2 }
 0x1a2   :  { %v246_v8 = vrot.slane %v245_v6, 2 }
 0x1a3   :  { %v212_v31 = vmax.f32 %v210_v29, %v211_v30 }
 0x1a4   :  { %v247_v10 = vadd.f32 %v246_v8, %v245_v6 }
 0x1a5   :  { %v213_v32 = vrot.slane %v212_v31, 1 }
 0x1a6   :  { %v248_v11 = vrot.slane %v247_v10, 1 }
 0x1a7   :  { %v214_v33 = vmax.f32 %v212_v31, %v213_v32 }
 0x1a8   :  { %v249_v16 = vadd.f32 %v248_v11, %v247_v10 }
 0x1a9   :  { %v215_v35 = vsub.f32 %v199_v24, %v214_v33  ;;  %v216_v36 = vsub.f32 %v200_v22, %v214_v33  ;;  %vm251_vm5 = vcmp.eq.f32.partialorder %v199_v24, %v214_v33  ;;  %vm252_vm6 = vcmp.eq.f32.partialorder %v200_v22, %v214_v33 }
 0x1aa   :  { %v253_v41 = vsel %vm251_vm5, %v203_v39, 10  ;;  %v254_v42 = vsel %vm252_vm6, %v204_v40, 10 }
 0x1ab   :  { %v217_v37 = vmul.f32 1.442695, %v215_v35  ;;  %v219_v38 = vmul.f32 1.442695, %v216_v36  ;;  %v255_v44 = vsel %vm28_vm2, %v253_v41, 2147483647 }
 0x1ac   :  { %v256_v45 = vsel %vm206_vm4, %v254_v42, 2147483647 }
 0x1ad   :  { %321 = vpow2.f32 %v217_v37  ;;  %vm257_vm7 = vcmp.lt.s32.totalorder %v255_v44, %v256_v45 }
 0x1ae   :  { %323 = vpow2.f32 %v219_v38  ;;  %v258_v49 = vsel %vm257_vm7, %v255_v44, %v256_v45 }
 0x1af   :  { %v259_v55 = vrot.slane %v258_v49, 4 }
 0x1b1   :  { %vm260_vm10 = vcmp.lt.s32.totalorder %v258_v49, %v259_v55 }
 0x1b2   :  { %v261_v63 = vsel %vm260_vm10, %v258_v49, %v259_v55 }
 0x1b3   :  { %v262_v4 = vrot.slane %v261_v63, 2 }
 0x1b5   :  { %vm263_vm11 = vcmp.lt.s32.totalorder %v261_v63, %v262_v4 }
 0x1b6   :  { %v264_v7 = vsel %vm263_vm11, %v261_v63, %v262_v4 }
 0x1b7   :  { %v265_v9 = vrot.slane %v264_v7, 1 }
 0x1b9   :  { %vm266_vm12 = vcmp.lt.s32.totalorder %v264_v7, %v265_v9 }
 0x1ba   :  { %v322_v48 = vpop.eup %321  ;;  %v267_v13 = vsel %vm266_vm12, %v264_v7, %v265_v9 }
 0x1bb   :  { %v324_v50 = vpop.eup %323  ;;  %v221_v51 = vsel %vm28_vm2, %v322_v48, 0.0  ;;  %vm268_vm13 = vcmp.eq.s32.totalorder %v267_v13, %v201_v46 }
 0x1bc   :  { %v222_v52 = vsel %vm206_vm4, %v324_v50, 0.0  ;;  %v291_v19 = vsel %vm268_vm13, 1.0, %v327_v0 }
 0x1bd   :  { %v223_v54 = vadd.f32 %v222_v52, %v221_v51  ;;  %v279_v22 = vmul.f32 %v291_v19, %v271_v18 }
 0x1bf   :  { %v224_v57 = vrot.slane %v223_v54, 4  ;;  %v280_v23 = vsel %vm273_vm14, %v279_v22, 0.0 }
 0x1c1   :  { %v225_v59 = vadd.f32 %v224_v57, %v223_v54 }
 0x1c3   :  { %v226_v61 = vrot.slane %v225_v59, 2 }
 0x1c5   :  { %v227_v1 = vadd.f32 %v226_v61, %v225_v59 }
 0x1c7   :  { %v228_v2 = vrot.slane %v227_v1, 1 }
 0x1c9   :  { %v229_v5 = vadd.f32 %v228_v2, %v227_v1 }
 0x1cb   :  { %325 = vlog2.f32 %v229_v5 }
 0x1d8   :  { %v326_v12 = vpop.eup %325 }
 0x1d9   :  { %v231_v14 = vmul.f32 0.6931472, %v326_v12 }
 0x1db   :  { %v232_v15 = vadd.f32 %v231_v14, %v214_v33 }
 0x1dd   :  { %v250_v17 = vsub.f32 %v232_v15, %v249_v16 }
 0x1df   :  { %v272_v20 = vmul.f32 %v271_v18, %v250_v17 }
 0x1e1   :  { %v274_v21 = vsel %vm273_vm14, %v272_v20, 0.0 }
 0x1e2   :  { %275 = vadd.xlane.f32.xlu1 %v274_v21 }
 0x1e6   :  { %281 = vadd.xlane.f32.xlu1 %v280_v23 }
 0x26b   :  { %v276_v24 = vpop.xlane.xlu1 %275 }
 0x26c   :  { %278 = vst.msk [vmem:[%s417_s6] sm:$0x1] %vm277_vm15, %v276_v24 }
 0x26f   :  { %v282_v25 = vpop.xlane.xlu1 %281 }
 0x270   :  { %284 = vst.msk [vmem:[%s417_s6] sm:$0x1] %vm283_vm0, %v282_v25 }

</bundles_post_ra>
